<compile_context>
chip_gen: v6e
topology: v6e:2x2x1
jax: 0.10.0
libtpu: 0.0.40
codegen_flags: <defaults>
</compile_context>

<pallas_src>
import jax
import jax.numpy as jnp
from jax.experimental import pallas as pl
from jax.experimental.pallas import tpu as pltpu

NUM_CLASSES = 10
FEAT_DIM = 512
LANE = 128
MAX_TB = 2048  # plenty for a full MXU M dim; bounds the output double-buffer


def _pool_matmul_kernel(x_ref, w_ref, b_ref, out_ref, acc_ref):
    """GAP (sum over lane-dense HW) -> matmul -> bias.

    x_ref:   (TB, C, HW_T) batch tile of activations (lane dim = HW tile)
    w_ref:   (C, NC_pad)   fused frozen weight ((1/HW) * w_enc @ w_fc.T), padded
    b_ref:   (1, NC_pad)   fc bias, padded
    out_ref: (TB, NC_pad)  padded logits
    acc_ref: (TB, C)       f32 pooling accumulator (scratch)
    """
    h = pl.program_id(1)

    @pl.when(h == 0)
    def _():
        acc_ref[...] = jnp.zeros_like(acc_ref)

    acc_ref[...] += jnp.sum(x_ref[...].astype(jnp.float32), axis=-1)

    @pl.when(h == pl.num_programs(1) - 1)
    def _():
        logits = jnp.dot(acc_ref[...], w_ref[...],
                         preferred_element_type=jnp.float32)
        out_ref[...] = logits + b_ref[...]


def _fold_matmul_kernel(x_ref, w_ref, b_ref, out_ref):
    """Pooling folded into the matmul (used when HW % 128 != 0).

    x_ref: (TB, C*HW); w_ref: (C*HW, NC_pad); b_ref: (1, NC_pad).
    """
    out_ref[...] = (
        jnp.dot(x_ref[...], w_ref[...], preferred_element_type=jnp.float32)
        + b_ref[...])


def _vmem_capacity_bytes():
    try:
        cap = getattr(pltpu.get_tpu_info(), "vmem_capacity_bytes", None)
        if cap:
            return int(cap)
    except Exception:
        pass
    return 64 << 20  # conservative default (v7x per-TensorCore)


def _round_down(x, m):
    return (x // m) * m


def _choose_batch_tile(B, row_bytes, x_budget):
    """Largest TB (multiple of 8, <= MAX_TB) whose x tile fits x_budget."""
    tb = max(min(B, 8), _round_down(x_budget // max(row_bytes, 1), 8))
    tb = min(tb, MAX_TB)
    if tb >= B:
        tb = B
    return tb


def _choose_hw_tile(HW, budget_bytes, bytes_per_hw_elem):
    """Largest multiple-of-128 divisor of HW fitting budget (HW % 128 == 0)."""
    max_hw = max(128, _round_down(budget_bytes // max(bytes_per_hw_elem, 1), 128))
    n128 = HW // 128
    for cand in range(min(n128, max_hw // 128), 0, -1):
        if n128 % cand == 0:
            return cand * 128
    return 128


def linear_classifier_forward(x_nchw, w_enc, w_fc, b_fc, *, stream_dtype=None):
    """x_nchw: (B, C, H, W); w_enc: (C, FEAT); w_fc: (NC, FEAT); b_fc: (NC,).

    Returns logits (B, NC).
    """
    B, C, H, W = x_nchw.shape
    HW = H * W
    nc = w_fc.shape[0]
    nc_pad = pl.cdiv(nc, LANE) * LANE

    # Fold encoder projection + 1/HW mean scale into the fc head (exact up to
    # f32 rounding):
    #   mean(x,HW) @ w_enc @ w_fc.T + b == sum(x,HW) @ [(1/HW) w_enc w_fc.T] + b
    w_comb = (w_enc @ w_fc.T) * (1.0 / HW)                       # (C, NC)
    w_comb = jnp.pad(w_comb, ((0, 0), (0, nc_pad - nc)))         # (C, NC_pad)
    b_pad = jnp.pad(b_fc, (0, nc_pad - nc)).reshape(1, nc_pad)   # (1, NC_pad)

    if stream_dtype is not None:
        x_nchw = x_nchw.astype(stream_dtype)
    itemsize = jnp.dtype(x_nchw.dtype).itemsize

    # Generation-aware VMEM budget: cap at 7/8 of physical VMEM (112 MiB on
    # v5e/v6e, 56 MiB on v7x); target ~30% of it per (double-buffered) x buf.
    vmem_cap = _vmem_capacity_bytes()
    vmem_limit = min(vmem_cap, max(32 << 20, (vmem_cap * 7) // 8))
    x_budget = int(vmem_limit * 0.30)

    if HW % LANE == 0:
        # Lane-dense pooling path: x streams as (B, C, HW), reduce over lanes.
        x = x_nchw.reshape(B, C, HW)  # free reshape, no transpose over HBM
        row_bytes = C * HW * itemsize
        min_tb = min(B, 8)
        if min_tb * row_bytes <= x_budget:
            hw_t = HW
            tb = _choose_batch_tile(B, row_bytes, x_budget)
        else:
            # Feature map too large even for an 8-row tile: split HW so the
            # block stays inside the per-generation VMEM budget (needed on
            # v7x's 64 MiB for e.g. C=512, HW>=4096 maps).
            tb = min_tb
            hw_t = _choose_hw_tile(HW, x_budget, tb * C * itemsize)

        grid = (pl.cdiv(B, tb), HW // hw_t)

        cost = pl.CostEstimate(
            flops=int(2 * B * C * nc_pad + B * C * HW),
            transcendentals=0,
            bytes_accessed=int(B * C * HW * itemsize
                               + (C + 1) * nc_pad * 4
                               + B * nc_pad * 4),
        )

        out_padded = pl.pallas_call(
            _pool_matmul_kernel,
            out_shape=jax.ShapeDtypeStruct((B, nc_pad), jnp.float32),
            grid=grid,
            in_specs=[
                pl.BlockSpec((tb, C, hw_t), lambda i, h: (i, 0, h)),
                pl.BlockSpec((C, nc_pad), lambda i, h: (0, 0)),
                pl.BlockSpec((1, nc_pad), lambda i, h: (0, 0)),
            ],
            out_specs=pl.BlockSpec((tb, nc_pad), lambda i, h: (i, 0)),
            scratch_shapes=[pltpu.VMEM((tb, C), jnp.float32)],
            compiler_params=pltpu.CompilerParams(
                dimension_semantics=("parallel", "arbitrary"),
                vmem_limit_bytes=int(vmem_limit)),
            cost_estimate=cost,
        )(x, w_comb, b_pad)
    else:
        # HW not a multiple of 128 (e.g. 7x7 / 14x14 maps): keep the lane dim
        # dense by streaming x as (B, C*HW) and folding the pooling into the
        # matmul against a row-replicated weight (W_big[c*HW + hw] = w_comb[c]).
        K = C * HW
        x = x_nchw.reshape(B, K)
        w_big = jnp.broadcast_to(
            w_comb[:, None, :], (C, HW, nc_pad)).reshape(K, nc_pad)
        if stream_dtype is not None:
            w_big = w_big.astype(stream_dtype)
        # TODO(synk): for very large C*HW with HW % 128 != 0 the resident
        # (K, 128) weight / single-K block may exceed VMEM; that case would
        # need a K-split grid with masking of the padded tail.
        row_bytes = K * itemsize
        tb = _choose_batch_tile(B, row_bytes, x_budget)
        grid = (pl.cdiv(B, tb),)

        cost = pl.CostEstimate(
            flops=int(2 * B * K * nc_pad),
            transcendentals=0,
            bytes_accessed=int(B * K * itemsize + K * nc_pad * 4
                               + B * nc_pad * 4 + nc_pad * 4),
        )

        out_padded = pl.pallas_call(
            _fold_matmul_kernel,
            out_shape=jax.ShapeDtypeStruct((B, nc_pad), jnp.float32),
            grid=grid,
            in_specs=[
                pl.BlockSpec((tb, K), lambda i: (i, 0)),
                pl.BlockSpec((K, nc_pad), lambda i: (0, 0)),
                pl.BlockSpec((1, nc_pad), lambda i: (0, 0)),
            ],
            out_specs=pl.BlockSpec((tb, nc_pad), lambda i: (i, 0)),
            compiler_params=pltpu.CompilerParams(
                dimension_semantics=("parallel",),
                vmem_limit_bytes=int(vmem_limit)),
            cost_estimate=cost,
        )(x, w_big, b_pad)

    return out_padded[:, :nc]


def _reference(x_nchw, w_enc, w_fc, b_fc):
    B, C, H, W = x_nchw.shape
    pooled = jnp.mean(x_nchw.reshape(B, C, H * W), axis=-1)   # GAP
    feats = pooled @ w_enc
    return feats @ w_fc.T + b_fc


if __name__ == "__main__":
    # TODO(synk): the real encoder is an external frozen module (e.g. a SimCLR
    # ResNet18 backbone); it is represented by a deterministic frozen
    # GAP + linear stub so the two frozen linears can be folded.
    key = jax.random.PRNGKey(0)
    k_x, k_enc, k_w, k_b, k_x2 = jax.random.split(key, 5)

    B, C, H, W = 2, 4, 16, 16
    x = jax.random.normal(k_x, (B, C, H, W), dtype=jnp.float32)

    # frozen "encoder" projection C -> 512
    w_enc = jax.random.normal(k_enc, (C, FEAT_DIM), dtype=jnp.float32) * 0.1

    # nn.Linear(512, 10): weight (10, 512), bias (10,), PyTorch uniform init
    bound = 1.0 / jnp.sqrt(jnp.float32(FEAT_DIM))
    w_fc = jax.random.uniform(k_w, (NUM_CLASSES, FEAT_DIM),
                              minval=-bound, maxval=bound, dtype=jnp.float32)
    b_fc = jax.random.uniform(k_b, (NUM_CLASSES,),
                              minval=-bound, maxval=bound, dtype=jnp.float32)

    # Path 1: HW multiple of 128 (lane-dense pooling kernel).
    logits = jax.block_until_ready(
        linear_classifier_forward(x, w_enc, w_fc, b_fc))
    ref = _reference(x, w_enc, w_fc, b_fc)
    assert logits.shape == (B, NUM_CLASSES)
    assert jnp.allclose(logits, ref, atol=1e-4, rtol=1e-4), "pool path mismatch"

    # Path 2: HW not a multiple of 128 (pooling folded into the matmul).
    x2 = jax.random.normal(k_x2, (B, C, 7, 7), dtype=jnp.float32)
    logits2 = jax.block_until_ready(
        linear_classifier_forward(x2, w_enc, w_fc, b_fc))
    ref2 = _reference(x2, w_enc, w_fc, b_fc)
    assert logits2.shape == (B, NUM_CLASSES)
    assert jnp.allclose(logits2, ref2, atol=1e-4, rtol=1e-4), "folded path mismatch"

    print("KERNEL_OK")
</pallas_src>

<mosaic_0001>
module attributes {stable_mosaic.version = 11 : i64} {
  func.func @_pool_matmul_kernel(%arg0: i32, %arg1: i32, %arg2: memref<2x4x256xf32, #tpu.memory_space<vmem>>, %arg3: memref<4x128xf32, #tpu.memory_space<vmem>>, %arg4: memref<1x128xf32, #tpu.memory_space<vmem>>, %arg5: memref<2x128xf32, #tpu.memory_space<vmem>>, %arg6: memref<2x4xf32, #tpu.memory_space<vmem>>) attributes {dimension_semantics = [#tpu.dimension_semantics<parallel>, #tpu.dimension_semantics<arbitrary>], iteration_bounds = array<i64: 1, 1>, scalar_prefetch = 0 : i64, scratch_operands = 1 : i64, tpu.core_type = #tpu.core_type<tc>, window_params = [{transform_indices = @transform_0, window_bounds = array<i64: 2, 4, 256>}, {pipeline_mode = #tpu.pipeline_mode<synchronous>, transform_indices = @transform_1, window_bounds = array<i64: 4, 128>}, {pipeline_mode = #tpu.pipeline_mode<synchronous>, transform_indices = @transform_2, window_bounds = array<i64: 1, 128>}, {transform_indices = @transform_3, window_bounds = array<i64: 2, 128>}]} {
    %c0_i32 = arith.constant 0 : i32
    %0 = arith.cmpi eq, %arg1, %c0_i32 : i32
    %1 = arith.extui %0 : i1 to i32
    %c0_i32_0 = arith.constant 0 : i32
    %2 = arith.cmpi ne, %1, %c0_i32_0 : i32
    scf.if %2 {
      %cst_9 = arith.constant 0.000000e+00 : f32
      %11 = vector.broadcast %cst_9 : f32 to vector<2x4xf32>
      %c0_10 = arith.constant 0 : index
      %c0_11 = arith.constant 0 : index
      %12 = vector.load %arg6[%c0_10, %c0_11] : memref<2x4xf32, #tpu.memory_space<vmem>>, vector<2x4xf32>
      tpu.vector_store %arg6[%c0_10, %c0_11], %11 {strides = array<i32>} : memref<2x4xf32, #tpu.memory_space<vmem>>, vector<2x4xf32>,
    } else {
    }
    %c0 = arith.constant 0 : index
    %c0_1 = arith.constant 0 : index
    %3 = vector.load %arg6[%c0, %c0_1] : memref<2x4xf32, #tpu.memory_space<vmem>>, vector<2x4xf32>
    %c0_2 = arith.constant 0 : index
    %c0_3 = arith.constant 0 : index
    %c0_4 = arith.constant 0 : index
    %4 = vector.load %arg2[%c0_2, %c0_3, %c0_4] : memref<2x4x256xf32, #tpu.memory_space<vmem>>, vector<2x4x256xf32>
    %cst = arith.constant dense<0.000000e+00> : vector<2x4xf32>
    %5 = vector.multi_reduction <add>, %4, %cst [2] : vector<2x4x256xf32> to vector<2x4xf32>
    %6 = arith.addf %3, %5 : vector<2x4xf32>
    %c0_5 = arith.constant 0 : index
    %c0_6 = arith.constant 0 : index
    %7 = vector.load %arg6[%c0_5, %c0_6] : memref<2x4xf32, #tpu.memory_space<vmem>>, vector<2x4xf32>
    tpu.vector_store %arg6[%c0_5, %c0_6], %6 {strides = array<i32>} : memref<2x4xf32, #tpu.memory_space<vmem>>, vector<2x4xf32>,
    %c0_i32_7 = arith.constant 0 : i32
    %8 = arith.cmpi eq, %arg1, %c0_i32_7 : i32
    %9 = arith.extui %8 : i1 to i32
    %c0_i32_8 = arith.constant 0 : i32
    %10 = arith.cmpi ne, %9, %c0_i32_8 : i32
    scf.if %10 {
      %c0_9 = arith.constant 0 : index
      %c0_10 = arith.constant 0 : index
      %11 = vector.load %arg6[%c0_9, %c0_10] : memref<2x4xf32, #tpu.memory_space<vmem>>, vector<2x4xf32>
      %c0_11 = arith.constant 0 : index
      %c0_12 = arith.constant 0 : index
      %12 = vector.load %arg3[%c0_11, %c0_12] : memref<4x128xf32, #tpu.memory_space<vmem>>, vector<4x128xf32>
      %cst_13 = arith.constant dense<0.000000e+00> : vector<2x128xf32>
      %13 = tpu.matmul %11, %12, %cst_13 {dimension_numbers = #tpu.dot_dimension_numbers<[1], [0], [0], [1], [0, 0, 1, 1], [], []>} : vector<2x4xf32>, vector<4x128xf32>, vector<2x128xf32> -> vector<2x128xf32>
      %c0_14 = arith.constant 0 : index
      %c0_15 = arith.constant 0 : index
      %14 = vector.load %arg4[%c0_14, %c0_15] : memref<1x128xf32, #tpu.memory_space<vmem>>, vector<1x128xf32>
      %15 = vector.broadcast %14 : vector<1x128xf32> to vector<2x128xf32>
      %16 = arith.addf %13, %15 : vector<2x128xf32>
      %c0_16 = arith.constant 0 : index
      %c0_17 = arith.constant 0 : index
      %17 = vector.load %arg5[%c0_16, %c0_17] : memref<2x128xf32, #tpu.memory_space<vmem>>, vector<2x128xf32>
      tpu.vector_store %arg5[%c0_16, %c0_17], %16 {strides = array<i32>} : memref<2x128xf32, #tpu.memory_space<vmem>>, vector<2x128xf32>,
    } else {
    }
    return
  }
  func.func @transform_0(%arg0: i32, %arg1: i32) -> (i32, i32, i32) {
    %c0_i32 = arith.constant 0 : i32
    %c0_i32_0 = arith.constant 0 : i32
    return %arg0, %c0_i32, %arg1 : i32, i32, i32
  }
  func.func @transform_1(%arg0: i32, %arg1: i32) -> (i32, i32) {
    %c0_i32 = arith.constant 0 : i32
    %c0_i32_0 = arith.constant 0 : i32
    %c0_i32_1 = arith.constant 0 : i32
    return %c0_i32, %c0_i32_0 : i32, i32
  }
  func.func @transform_2(%arg0: i32, %arg1: i32) -> (i32, i32) {
    %c0_i32 = arith.constant 0 : i32
    %c0_i32_0 = arith.constant 0 : i32
    %c0_i32_1 = arith.constant 0 : i32
    return %c0_i32, %c0_i32_0 : i32, i32
  }
  func.func @transform_3(%arg0: i32, %arg1: i32) -> (i32, i32) {
    %c0_i32 = arith.constant 0 : i32
    %c0_i32_0 = arith.constant 0 : i32
    return %arg0, %c0_i32 : i32, i32
  }
}

</mosaic_0001>

<bundles_post_ra>
// kernel: tpu_custom_call.1
= control target key start
LH: loop header
LB: loop body
LE: loop exit
PB: predicated region body
PF: predicated region fallthrough
CT: control target
= control target key end

     0   :  { %8 = vsyncpa [#allocation4], 0  ;;  %s322_s0 = inlined_call_operand.hbm [shape: f32[2,4,256], index: 0, kind: input, shape index: {}]   ;;  %s323_s1 = inlined_call_operand.hbm [shape: f32[4,128], index: 1, kind: input, shape index: {}]   ;;  %s324_s2 = inlined_call_operand.vmem [shape: f32[1,128], index: 2, kind: input, shape index: {}]   ;;  %s325_s3 = inlined_call_operand.hbm [shape: f32[2,128], index: 3, kind: output, shape index: {}]  }
   0x1   :  { %9 = vsyncpa [#allocation7], 0 }
   0x2   :  { %10 = vsyncpa [#allocation5], 0  ;;  %s276_s12 = smov [#allocation3]  }
   0x3   :  { %s16_s13 = sshll.u32 %s276_s12, 4  ;;  %s17_s13 = int_to_ptr.vmem [resolvable:$true] %s16_s13 }
   0x4   :  { %s218_s14 = scalar_lea.vmem %s17_s13, 256  ;;  %p223_p1 = scmp.lt.s32.totalorder %s17_s13, %s17_s13 }
   0x5   :  { %p219_p0 = scmp.ne.s32.totalorder %s17_s13, %s218_s14  ;;  %p224_p2 = scmp.lt.s32.totalorder %s218_s14, %s218_s14 }
   0x7   :  { %p225_p3 = por %p224_p2, %p223_p1 }
   0x9   :  { %p226_p4 = pnand %p225_p3, %p219_p0 }
   0xb   :  { %229 = shalt.err (!%p226_p4)
}
   0xc   :  { %s277_s15 = smov 128   ;;  %s278_s16 = smov 8  }
   0xd   :  { %22 = dma.hbm_to_vmem [thread:$0]  %s322_s0, 256, %s17_s13, [#allocation4], %s277_s15, %s277_s15, %s278_s16  }
   0xe   :  { %s279_s19 = smov [#allocation6]  }
   0xf   :  { %s29_s20 = sshll.u32 %s279_s19, 4  ;;  %s30_s20 = int_to_ptr.vmem [resolvable:$true] %s29_s20 }
  0x10   :  { %s238_s21 = scalar_lea.vmem %s30_s20, 64  ;;  %p243_p6 = scmp.lt.s32.totalorder %s30_s20, %s30_s20 }
  0x11   :  { %p239_p5 = scmp.ne.s32.totalorder %s30_s20, %s238_s21  ;;  %p244_p7 = scmp.lt.s32.totalorder %s238_s21, %s238_s21 }
  0x13   :  { %p245_p8 = por %p244_p7, %p243_p6 }
  0x15   :  { %p246_p9 = pnand %p245_p8, %p239_p5 }
  0x17   :  { %249 = shalt.err (!%p246_p9)
}
  0x18   :  { %32 = dma.hbm_to_vmem [thread:$0]  %s323_s1, 64, %s30_s20, [#allocation7]  }
  0x19   :  { %270 = dma.done.wait [#allocation4], 256  }
  0x1a   :  { %271 = vsyncadd [#allocation4], 4294967040 }
  0x1b   :  { %272 = dma.done.wait [#allocation7], 64  }
  0x1c   :  { %273 = vsyncadd [#allocation7], 4294967232  ;;  %vm56_vm0 = vcmask 1043456   ;;  %v48_v0 = vld [vmem:[#allocation3] sm:$0xff]  ;;  %v49_v1 = vld [vmem:[#allocation3 + $0x8] sm:$0xff]  ;;  %vm45_vm1 = vcmask 25600   ;;  %v69_v12 = vlaneseq }
  0x1d   :  { %v52_v2 = vcombine.high %v48_v0, %v48_v0  ;;  %v57_v3 = vsel %vm56_vm0, %v48_v0, 0.0  ;;  %v53_v4 = vcombine.high %v49_v1, %v49_v1  ;;  %v62_v6 = vsel %vm56_vm0, %v49_v1, 0.0  ;;  %v89_v11 = vld [vmem:[#allocation6] sm:$0xf]  ;;  %v191_v24 = vld [vmem:[%s324_s2] ss:$0 sm:$0xff] }
  0x1e   :  { %v280_v10 = vmov 0.0   ;;  %vm281_vm2 = vmmov 0   ;;  %v70_v13 = vand.u32 127, %v69_v12  ;;  %v72_v14 = vshrl.u32 %v69_v12, 7  ;;  %s282_s24 = smov [#allocation8]  }
  0x1f   :  { %v58_v5 = vsel %vm56_vm0, %v52_v2, 0.0  ;;  %v63_v7 = vsel %vm56_vm0, %v53_v4, 0.0  ;;  %46 = vst.msk [vmem:[#allocation2] sm:$0x3] %vm45_vm1, %v280_v10  ;;  %196 = vmatprep.subr.mxu0 %v280_v10  ;;  %198 = vmatprep.mubr.msk.f32.mxu0 %vm281_vm2, %v280_v10  ;;  %vm79_vm3 = vcmask 1041409   ;;  %vm97_vm4 = vcmask 31744  }
  0x20   :  { %v59_v8 = vadd.f32 %v58_v5, %v57_v3  ;;  %v64_v9 = vadd.f32 %v63_v7, %v62_v6  ;;  %197 = vmatpush3.msk.msra.mxu0 %vm56_vm0, %v89_v11  ;;  %v73_v16 = vsub.s32 %v70_v13, %v72_v14  ;;  %s181_s25 = sshll.u32 %s282_s24, 4  ;;  %s182_s25 = int_to_ptr.vmem [resolvable:$true] %s181_s25 }
  0x21   :  { %s250_s26 = scalar_lea.vmem %s182_s25, 32  ;;  %p255_p11 = scmp.lt.s32.totalorder %s182_s25, %s182_s25 }
  0x22   :  { %60 = vadd.xlane.f32.xlu0 %v59_v8  ;;  %p251_p10 = scmp.ne.s32.totalorder %s182_s25, %s250_s26  ;;  %p256_p12 = scmp.lt.s32.totalorder %s250_s26, %s250_s26 }
  0x24   :  { %p257_p13 = por %p256_p12, %p255_p11 }
  0x26   :  { %65 = vadd.xlane.f32.xlu0 %v64_v9  ;;  %v47_v20 = vld [vmem:[#allocation2] sm:$0x3]  ;;  %p258_p0 = pnand %p257_p13, %p251_p10 }
  0xab   :  { %v61_v15 = vpop.xlane.xlu0 %60 }
  0xac   :  { %v74_v18 = vrot.slane %v61_v15, %v73_v16 }
  0xaf   :  { %v66_v17 = vpop.xlane.xlu0 %65 }
  0xb0   :  { %v78_v19 = vrot.slane %v66_v17, %v73_v16 }
  0xb2   :  { %v80_v21 = vsel %vm79_vm3, %v78_v19, %v74_v18 }
  0xb3   :  { %v82_v22 = vadd.f32 %v80_v21, %v47_v20 }
  0xb5   :  { %84 = vst.msk [vmem:[#allocation2] sm:$0x3] %vm45_vm1, %v82_v22 }
  0xbc   :  { %v88_v23 = vld [vmem:[#allocation2] sm:$0x3] }
  0xbd   :  { %199 = vmatmul.mubr.msk.f32.vlgmr.msra.gmra.mxu0 %vm97_vm4, %v88_v23 }
 0x17d   :  { %v170_v25 = vpop.f32.mrf.mxu0 }
 0x17e   :  { %v171_v26 = vadd.f32 %v191_v24, %v170_v25 }
 0x17f   :  { %v200_v27 = vpop.f32.mrf.mxu0 }
 0x180   :  { %174 = vst [vmem:[#allocation8] sm:$0x3] %v171_v26 }
 0x181   :  { %261 = shalt.err (!%p258_p0)
}
 0x182   :  { %184 = dma.vmem_to_hbm [thread:$0]  %s182_s25, 32, %s325_s3, [#allocation5]  }
 0x183   :  { %274 = dma.done.wait [#allocation5], 32  }
 0x184   :  { %275 = vsyncadd [#allocation5], 4294967264 }
 0x185   :  { %188 = vsyncpa [#allocation4], 1 }
 0x186   :  { %189 = vsyncpa [#allocation7], 1 }
 0x187   :  { %190 = vsyncpa [#allocation5], 1 }

</bundles_post_ra>
